<compile_context>
chip_gen: v5e
topology: v5e:2x2
jax: 0.10.0
libtpu: 0.0.40
codegen_flags: <defaults>
</compile_context>

<pallas_src>
import jax
import jax.numpy as jnp
import numpy as np
from jax.experimental import pallas as pl
from jax.experimental.pallas import tpu as pltpu

BLOCK = 32  # BlockSparseLinear.OPTIMIZED_BLOCK_SIZE


# --------------------------------------------------------------------------- #
# Kernel
# --------------------------------------------------------------------------- #
def _bsl_kernel(cnt_ref, x_ref, w_ref, b_ref, o_ref, acc_ref):
    """Grid step (m, j, k): acc += x_tile @ w_slab; epilogue writes 2*acc+b."""
    j = pl.program_id(1)
    k = pl.program_id(2)

    @pl.when(k == 0)
    def _init():
        acc_ref[...] = jnp.zeros_like(acc_ref)

    # Skip padded k-steps of output tiles that have fewer packed K tiles.
    @pl.when(k < cnt_ref[j])
    def _accum():
        acc_ref[...] += jnp.dot(
            x_ref[...], w_ref[...], preferred_element_type=jnp.float32
        )

    @pl.when(k == pl.num_programs(2) - 1)
    def _epilogue():
        # sparse path (x @ W^T) + dense path (x @ W^T + bias)
        o_ref[...] = 2.0 * acc_ref[...] + b_ref[...]


# --------------------------------------------------------------------------- #
# Tile selection
# --------------------------------------------------------------------------- #
def _pick_tile_n(N):
    # Lane-dense output tile; prefer N // tn >= 2 so the "parallel" output axis
    # shards across both TensorCores on v7x.
    for tn in (512, 256, 128):
        if N % tn == 0 and N // tn >= 2:
            return tn
    for tn in (512, 256, 128):
        if N % tn == 0:
            return tn
    return N


def _pick_tile_k(K):
    # Big contiguous reduction tile -> MiB-class weight slabs per grid step.
    for tk in (2048, 1024, 512, 256, 128):
        if K % tk == 0:
            return tk
    return K


def _pick_tile_m(M):
    if M <= 512:
        return M, M
    tm = 256
    return tm, ((M + tm - 1) // tm) * tm


# --------------------------------------------------------------------------- #
# Wrapper
# --------------------------------------------------------------------------- #
def block_sparse_linear(x, weight, bias=None, block_mask=None):
    """out = 2 * (x @ W^T) + bias, float16 in / float16 out.

    block_mask is the STATIC (N//32, K//32) boolean 32x32-block sparsity
    pattern of `weight`.  Everything derived from it (tile CSR, weight
    repacking) is parameter-init-time work in a real module; it runs per call
    here only because this is a self-contained functional wrapper.
    """
    M, K = x.shape
    N, K2 = weight.shape
    assert K == K2 and K % BLOCK == 0 and N % BLOCK == 0

    tn = _pick_tile_n(N)
    tk = _pick_tile_k(K)
    tm, M_pad = _pick_tile_m(M)
    nj, nm = N // tn, M_pad // tm
    KB = K // BLOCK
    spt = tk // BLOCK  # 32-row strips per K tile

    # ---- static block-mask analysis + weight repack (host, one-time) -------
    wt = np.asarray(jax.device_get(weight)).astype(np.float32).T  # (K, N)
    if block_mask is None:
        bm = np.ones((N // BLOCK, KB), dtype=bool)
    else:
        bm = np.asarray(jax.device_get(block_mask)).astype(bool)
        assert bm.shape == (N // BLOCK, KB)
        # Enforce module semantics: weight is zero outside the masked blocks.
        wt = wt * np.repeat(np.repeat(bm, BLOCK, axis=0), BLOCK, axis=1).T

    strip_nz = bm.reshape(nj, tn // BLOCK, KB).any(axis=1)  # (nj, KB)
    counts_strips = strip_nz.sum(axis=1)
    kept_frac = counts_strips.sum() / float(nj * KB)
    # Strip packing only pays when whole strips actually drop out (and tk is a
    # lane multiple so the gathered-x layout stays legal).
    use_packed = (kept_frac < 0.9) and (tk % 128 == 0)

    if use_packed:
        k_grid = max(1, int(-(-int(counts_strips.max()) // spt)))
        slots = k_grid * spt
        sids = np.zeros((nj, slots), dtype=np.int64)
        valid = np.zeros((nj, slots), dtype=bool)
        for j in range(nj):
            nz = np.flatnonzero(strip_nz[j])
            sids[j, : nz.size] = nz
            valid[j, : nz.size] = True
        rows = (sids[:, :, None] * BLOCK
                + np.arange(BLOCK)[None, None, :]).reshape(nj, slots * BLOCK)
        wp = np.zeros((nj, slots * BLOCK, tn), dtype=np.float32)
        for j in range(nj):
            wp[j] = wt[rows[j], j * tn:(j + 1) * tn]
        wp *= np.repeat(valid, BLOCK, axis=1)[:, :, None]  # zero padded strips
        w_in = jnp.asarray(wp.reshape(nj * k_grid, tk, tn)).astype(jnp.bfloat16)
        counts_kt = np.asarray(-(-counts_strips // spt), dtype=np.int32)
        col_sel = jnp.asarray(rows.reshape(-1).astype(np.int32))
    else:
        assert K % tk == 0
        k_grid = K // tk
        w_in = jnp.asarray(
            wt.reshape(k_grid, tk, nj, tn).transpose(2, 0, 1, 3)
              .reshape(nj * k_grid, tk, tn)
        ).astype(jnp.bfloat16)
        counts_kt = np.full((nj,), k_grid, dtype=np.int32)
        col_sel = None

    counts = jnp.asarray(counts_kt)  # 1-D int32 SMEM -> no 2-D SMEM padding

    # ---- per-call activation / bias prep ------------------------------------
    xb = x.astype(jnp.bfloat16)  # fp16 -> bf16 storage (dtype policy)
    if M_pad != M:
        xb = jnp.pad(xb, ((0, M_pad - M), (0, 0)))
    if use_packed:
        # gather only the kept K columns, laid out per output tile
        x_in = jnp.take(xb, col_sel, axis=1)  # (M_pad, nj*k_grid*tk)
    else:
        x_in = xb                              # (M_pad, K), untouched

    if bias is None:
        b_in = jnp.zeros((1, N), jnp.float32)
    else:
        b_in = bias.astype(jnp.float32).reshape(1, N)

    # ---- index maps (scalar-prefetched counts ref arrives last) ------------
    def _kk(k, cnt, j):
        # clamp so padded k-steps re-use the previous block -> no extra DMA
        return jnp.maximum(0, jnp.minimum(k, cnt[j] - 1))

    def w_index(m, j, k, cnt):
        return (j * k_grid + _kk(k, cnt, j), 0, 0)

    if use_packed:
        def x_index(m, j, k, cnt):
            return (m, j * k_grid + _kk(k, cnt, j))
    else:
        def x_index(m, j, k, cnt):
            return (m, k)

    total_steps = nm * nj * k_grid
    wbuf = 3 if total_steps >= 4 else 2
    vmem_est = (2 * tm * tk * 2 + wbuf * tk * tn * 2 + 2 * tn * 4
                + 2 * tm * tn * 4 + tm * tn * 4)
    assert vmem_est <= 48 * 1024 * 1024, "tile config exceeds v7x VMEM budget"
    vmem_limit = int(min(48 * 1024 * 1024, max(32 * 1024 * 1024, 2 * vmem_est)))

    out_f32 = pl.pallas_call(
        _bsl_kernel,
        out_shape=jax.ShapeDtypeStruct((M_pad, N), jnp.float32),
        grid_spec=pltpu.PrefetchScalarGridSpec(
            num_scalar_prefetch=1,
            grid=(nm, nj, k_grid),
            in_specs=[
                # x tiles: pipelined like a normal matmul operand
                pl.BlockSpec((tm, tk), x_index),
                # weight slabs: one contiguous (tk, tn) DMA per step
                pl.BlockSpec((None, tk, tn), w_index,
                             pipeline_mode=pl.Buffered(wbuf)),
                # bias row
                pl.BlockSpec((1, tn), lambda m, j, k, cnt: (0, j)),
            ],
            out_specs=pl.BlockSpec((tm, tn), lambda m, j, k, cnt: (m, j)),
            scratch_shapes=[pltpu.VMEM((tm, tn), jnp.float32)],
        ),
        compiler_params=pltpu.CompilerParams(
            dimension_semantics=("parallel", "parallel", "arbitrary"),
            vmem_limit_bytes=vmem_limit,
        ),
    )(counts, x_in, w_in, b_in)

    # Module returns float16; single rounding f32 -> fp16.
    return out_f32[:M].astype(jnp.float16)


# --------------------------------------------------------------------------- #
# Demo / self-check
# --------------------------------------------------------------------------- #
def _make_case(key, in_features, out_features, batch, density, zero_bias):
    kp, kw, kx, kb = jax.random.split(key, 4)
    X, Y = out_features // BLOCK, in_features // BLOCK
    n_sel = 1 + int(X * Y * density)
    perm = np.asarray(jax.random.permutation(kp, X * Y))
    bmask = np.zeros((X * Y,), dtype=bool)
    bmask[perm[:n_sel]] = True
    bmask = bmask.reshape(X, Y)

    w_full = jax.random.normal(kw, (out_features, in_features), jnp.float32)
    dense_mask = np.repeat(np.repeat(bmask, BLOCK, axis=0), BLOCK, axis=1)
    weight = (w_full * jnp.asarray(dense_mask, jnp.float32)).astype(jnp.float16)

    if zero_bias:  # module default: bias initialized to zeros(float16)
        bias = jnp.zeros((out_features,), dtype=jnp.float16)
    else:          # as if copied from a torch.nn.Linear
        bias = (0.1 * jax.random.normal(kb, (out_features,), jnp.float32)
                ).astype(jnp.float16)

    x = jax.random.normal(kx, (batch, in_features), jnp.float32).astype(jnp.float16)
    return x, weight, bias, bmask


if __name__ == "__main__":
    in_features, out_features, batch = 1024, 512, 16
    key = jax.random.PRNGKey(0)
    k1, k2 = jax.random.split(key)

    cases = [
        ("density=0.500 (dense tile-contiguous path)", k1, 0.5, True),
        ("density=0.125 (block-CSR strip-packed path)", k2, 0.125, False),
    ]

    for name, kk, density, zero_bias in cases:
        x, weight, bias, bmask = _make_case(
            kk, in_features, out_features, batch, density, zero_bias)
        y = jax.block_until_ready(block_sparse_linear(x, weight, bias, bmask))
        assert y.shape == (batch, out_features)
        assert y.dtype == jnp.float16

        yn = np.asarray(y.astype(jnp.float32))
        bn = np.asarray(bias.astype(jnp.float32))

        # (a) tight check vs the kernel's bf16-storage precision
        x_bf = np.asarray(x.astype(jnp.bfloat16).astype(jnp.float32))
        w_bf = np.asarray(weight.astype(jnp.bfloat16).astype(jnp.float32))
        ref_bf = (2.0 * (x_bf @ w_bf.T) + bn).astype(np.float16).astype(np.float32)
        np.testing.assert_allclose(yn, ref_bf, rtol=1e-2, atol=1e-2, err_msg=name)

        # (b) loose check vs exact fp16 module semantics (bf16 weight storage
        #     is a deliberate dtype-policy change vs the fp16 emulator)
        xn = np.asarray(x.astype(jnp.float32))
        wn = np.asarray(weight.astype(jnp.float32))
        ref_fp = (2.0 * (xn @ wn.T) + bn).astype(np.float16).astype(np.float32)
        np.testing.assert_allclose(yn, ref_fp, rtol=2e-2, atol=1.0, err_msg=name)

    print("KERNEL_OK")
</pallas_src>

<mosaic_0001>
module attributes {stable_mosaic.version = 11 : i64} {
  func.func @_bsl_kernel(%arg0: i32, %arg1: i32, %arg2: i32, %arg3: memref<2xi32, #tpu.memory_space<smem>>, %arg4: memref<16x1024xbf16, #tpu.memory_space<vmem>>, %arg5: memref<1x1024x256xbf16, #tpu.memory_space<vmem>>, %arg6: memref<1x256xf32, #tpu.memory_space<vmem>>, %arg7: memref<16x256xf32, #tpu.memory_space<vmem>>, %arg8: memref<16x256xf32, #tpu.memory_space<vmem>>) attributes {dimension_semantics = [#tpu.dimension_semantics<parallel>, #tpu.dimension_semantics<parallel>, #tpu.dimension_semantics<arbitrary>], iteration_bounds = array<i64: 1, 2, 1>, scalar_prefetch = 1 : i64, scratch_operands = 1 : i64, tpu.core_type = #tpu.core_type<tc>, window_params = [{transform_indices = @transform_0, window_bounds = array<i64: 16, 1024>}, {pipeline_mode = #tpu.pipeline_mode<double_buffered>, transform_indices = @transform_1, window_bounds = array<i64: 1, 1024, 256>}, {transform_indices = @transform_2, window_bounds = array<i64: 1, 256>}, {transform_indices = @transform_3, window_bounds = array<i64: 16, 256>}]} {
    %c0_i32 = arith.constant 0 : i32
    %0 = arith.cmpi eq, %arg2, %c0_i32 : i32
    %1 = arith.extui %0 : i1 to i32
    %c0_i32_0 = arith.constant 0 : i32
    %2 = arith.cmpi ne, %1, %c0_i32_0 : i32
    scf.if %2 {
      %cst = arith.constant 0.000000e+00 : f32
      %11 = vector.broadcast %cst : f32 to vector<16x256xf32>
      %c0 = arith.constant 0 : index
      %c0_4 = arith.constant 0 : index
      %12 = vector.load %arg8[%c0, %c0_4] : memref<16x256xf32, #tpu.memory_space<vmem>>, vector<16x256xf32>
      tpu.vector_store %arg8[%c0, %c0_4], %11 {strides = array<i32>} : memref<16x256xf32, #tpu.memory_space<vmem>>, vector<16x256xf32>,
    } else {
    }
    %3 = arith.index_cast %arg1 : i32 to index
    %4 = memref.load %arg3[%3] : memref<2xi32, #tpu.memory_space<smem>>
    %5 = arith.cmpi slt, %arg2, %4 : i32
    %6 = arith.extui %5 : i1 to i32
    %c0_i32_1 = arith.constant 0 : i32
    %7 = arith.cmpi ne, %6, %c0_i32_1 : i32
    scf.if %7 {
      %c0 = arith.constant 0 : index
      %c0_4 = arith.constant 0 : index
      %11 = vector.load %arg8[%c0, %c0_4] : memref<16x256xf32, #tpu.memory_space<vmem>>, vector<16x256xf32>
      %c0_5 = arith.constant 0 : index
      %c0_6 = arith.constant 0 : index
      %12 = vector.load %arg4[%c0_5, %c0_6] : memref<16x1024xbf16, #tpu.memory_space<vmem>>, vector<16x1024xbf16>
      %c0_7 = arith.constant 0 : index
      %c0_8 = arith.constant 0 : index
      %c0_9 = arith.constant 0 : index
      %13 = vector.load %arg5[%c0_7, %c0_8, %c0_9] : memref<1x1024x256xbf16, #tpu.memory_space<vmem>>, vector<1x1024x256xbf16>
      %14 = vector.shape_cast %13 : vector<1x1024x256xbf16> to vector<1024x256xbf16>
      %cst = arith.constant dense<0.000000e+00> : vector<16x256xf32>
      %15 = tpu.matmul %12, %14, %cst {dimension_numbers = #tpu.dot_dimension_numbers<[1], [0], [0], [1], [0, 0, 1, 1], [], []>} : vector<16x1024xbf16>, vector<1024x256xbf16>, vector<16x256xf32> -> vector<16x256xf32>
      %16 = arith.addf %11, %15 : vector<16x256xf32>
      %c0_10 = arith.constant 0 : index
      %c0_11 = arith.constant 0 : index
      %17 = vector.load %arg8[%c0_10, %c0_11] : memref<16x256xf32, #tpu.memory_space<vmem>>, vector<16x256xf32>
      tpu.vector_store %arg8[%c0_10, %c0_11], %16 {strides = array<i32>} : memref<16x256xf32, #tpu.memory_space<vmem>>, vector<16x256xf32>,
    } else {
    }
    %c0_i32_2 = arith.constant 0 : i32
    %8 = arith.cmpi eq, %arg2, %c0_i32_2 : i32
    %9 = arith.extui %8 : i1 to i32
    %c0_i32_3 = arith.constant 0 : i32
    %10 = arith.cmpi ne, %9, %c0_i32_3 : i32
    scf.if %10 {
      %c0 = arith.constant 0 : index
      %c0_4 = arith.constant 0 : index
      %11 = vector.load %arg8[%c0, %c0_4] : memref<16x256xf32, #tpu.memory_space<vmem>>, vector<16x256xf32>
      %cst = arith.constant 2.000000e+00 : f32
      %12 = vector.broadcast %cst : f32 to vector<16x256xf32>
      %13 = arith.mulf %12, %11 : vector<16x256xf32>
      %c0_5 = arith.constant 0 : index
      %c0_6 = arith.constant 0 : index
      %14 = vector.load %arg6[%c0_5, %c0_6] : memref<1x256xf32, #tpu.memory_space<vmem>>, vector<1x256xf32>
      %15 = vector.broadcast %14 : vector<1x256xf32> to vector<16x256xf32>
      %16 = arith.addf %13, %15 : vector<16x256xf32>
      %c0_7 = arith.constant 0 : index
      %c0_8 = arith.constant 0 : index
      %17 = vector.load %arg7[%c0_7, %c0_8] : memref<16x256xf32, #tpu.memory_space<vmem>>, vector<16x256xf32>
      tpu.vector_store %arg7[%c0_7, %c0_8], %16 {strides = array<i32>} : memref<16x256xf32, #tpu.memory_space<vmem>>, vector<16x256xf32>,
    } else {
    }
    return
  }
  func.func @transform_0(%arg0: i32, %arg1: i32, %arg2: i32, %arg3: memref<2xi32, #tpu.memory_space<smem>>) -> (i32, i32) {
    %c0_i32 = arith.constant 0 : i32
    return %arg0, %arg2 : i32, i32
  }
  func.func @transform_1(%arg0: i32, %arg1: i32, %arg2: i32, %arg3: memref<2xi32, #tpu.memory_space<smem>>) -> (i32, i32, i32) {
    %c1_i32 = arith.constant 1 : i32
    %0 = arith.muli %arg1, %c1_i32 : i32
    %1 = arith.index_cast %arg1 : i32 to index
    %2 = memref.load %arg3[%1] : memref<2xi32, #tpu.memory_space<smem>>
    %c1_i32_0 = arith.constant 1 : i32
    %3 = arith.subi %2, %c1_i32_0 : i32
    %4 = arith.minsi %arg2, %3 : i32
    %c0_i32 = arith.constant 0 : i32
    %5 = arith.maxsi %c0_i32, %4 : i32
    %6 = arith.addi %0, %5 : i32
    %c0_i32_1 = arith.constant 0 : i32
    %c0_i32_2 = arith.constant 0 : i32
    %c0_i32_3 = arith.constant 0 : i32
    return %6, %c0_i32_1, %c0_i32_2 : i32, i32, i32
  }
  func.func @transform_2(%arg0: i32, %arg1: i32, %arg2: i32, %arg3: memref<2xi32, #tpu.memory_space<smem>>) -> (i32, i32) {
    %c0_i32 = arith.constant 0 : i32
    %c0_i32_0 = arith.constant 0 : i32
    return %c0_i32, %arg1 : i32, i32
  }
  func.func @transform_3(%arg0: i32, %arg1: i32, %arg2: i32, %arg3: memref<2xi32, #tpu.memory_space<smem>>) -> (i32, i32) {
    %c0_i32 = arith.constant 0 : i32
    return %arg0, %arg1 : i32, i32
  }
}

</mosaic_0001>

<bundles_post_ra>
// kernel: tpu_custom_call.1
= control target key start
LH: loop header
LB: loop body
LE: loop exit
PB: predicated region body
PF: predicated region fallthrough
CT: control target
= control target key end

     0   :  { %s2558_s18 = smov [#allocation4]   ;;  %s3071_s0 = inlined_call_operand.hbm [shape: s32[2], index: 0, kind: input, shape index: {}]   ;;  %s3072_s1 = inlined_call_operand.hbm [shape: bf16[16,1024], index: 1, kind: input, shape index: {}]   ;;  %s3073_s2 = inlined_call_operand.hbm [shape: bf16[2,1024,256], index: 2, kind: input, shape index: {}]   ;;  %s3074_s3 = inlined_call_operand.hbm [shape: f32[1,512], index: 3, kind: input, shape index: {}]   ;;  %s3075_s4 = inlined_call_operand.hbm [shape: f32[16,512], index: 4, kind: output, shape index: {}]  }
   0x1   :  { %3076 = sst [smem:[#allocation16_spill]] %s3072_s1  ;;  %s10_s17 = sshll.u32 %s3071_s0, 4  ;;  %s11_s17 = int_to_ptr.hbm [resolvable:$true] %s10_s17 }
   0x2   :  { %3077 = sst [smem:[#allocation17_spill]] %s3073_s2 }
   0x3   :  { %13 = dma.hbm_to_smem %s11_s17, 16, %s2558_s18, [#allocation3] }
   0x4   :  { %2520 = dma.done.wait [#allocation3], 16 }
   0x5   :  { %2521 = vsyncadd [#allocation3], 4294967280 }
   0x6   :  { %16 = sfence }
   0x7   :  { %17 = vsyncpa [#allocation6], 0 }
   0x8   :  { %18 = vsyncpa [#allocation9], 0 }
   0x9   :  { %20 = vsyncpa [#allocation9 + $0x1], 0 }
   0xa   :  { %21 = vsyncpa [#allocation7], 0 }
   0xb   :  { %23 = vsyncpa [#allocation7 + $0x1], 0  ;;  %s2596_s19 = smov 0   ;;  %s2598_s20 = smov 0  }
   0xc   :  { %s2600_s21 = smov 0   ;;  %s2602_s22 = smov 0  }
   0xd   :  { %s2604_s0 = smov 0   ;;  %s2606_s23 = smov 0  }
   0xe LB: > { %s44_s24 = sadd.s32 1, %s2552_s0  ;;  %s97_s25 = sadd.s32 1, %s2544_s21  ;;  %s2556_s23 = sphi %s2606_s23, %s29_s23   ;;  %s2552_s0 = sphi %s2604_s0, %s3090_s0   ;;  %s2548_s22 = sphi %s2602_s22, %s3089_s22   ;;  %s2544_s21 = sphi %s2600_s21, %s3088_s21   ;;  %s2540_s20 = sphi %s2598_s20, %s3087_s20   ;;  %s2536_s19 = sphi %s2596_s19, %s3086_s19  }
   0xf   : > { %p46_p0 = scmp.ge.s32.totalorder %s44_s24, 2  ;;  %p104_p1 = scmp.ne.s32.totalorder %s2544_s21, %s2540_s20 }
  0x10   : > { %p105_p2 = scmp.eq.s32.totalorder %s2556_s23, 0  ;;  %p1572_p3 = scmp.ge.s32.totalorder %s2556_s23, 2 }
  0x11   : > { %s3092_s24 = smov (%p46_p0, %s44_s24), 0  ;;  %p2305_p5 = scmp.lt.s32.totalorder %s2556_s23, 2 }
  0x12   : > { %p2637_p4 = por %p105_p2, %p104_p1  ;;  %s94_s27 = ssub.s32 %s2552_s0, %s3092_s24 }
  0x13   : > { %s208_s28 = sand.u32 1, %s2556_s23   ;;  %p95_p6 = scmp.eq.s32.totalorder %s94_s27, 0 }
  0x14   : > { %s210_s29 = sand.u32 1, %s2544_s21   ;;  %s2141_s30 = sshll.u32 %s2552_s0, 10 }
  0x15   : > { %s2648_s5 = scalar_select %p95_p6, %s2544_s21, %s97_s25  }
  0x16   : > { %s1573_s6 = sshll.u32 %s210_s29, 10  ;;  %s3079_s2 = sld [smem:[#allocation17_spill]] }
  0x17   : > { %s212_s11 = scalar_lea.vmem [#allocation8], %s1573_s6  ;;  %p2659_p7 = pnand %p2305_p5, %p2637_p4 }
  0x18   : > { %s227_s12 = sshll.u32 %s212_s11, 4  ;;  %s2663_s14 = scalar_lea.sflag [#allocation9], %s208_s28  ;;  %s228_s12 = int_to_ptr.vmem [resolvable:$true] %s227_s12 }
  0x19   : > { %s2559_s15 = smov 128   ;;  %s2560_s16 = smov 8  }
  0x1a   : > { %s2669_s17 = sadd.s32 4294967295, %s2556_s23   ;;  %s1555_s18 = sadd.s32 4294967294, %s2556_s23  }
  0x1b   : > { %p110_p8 = scmp.ne.s32.totalorder %s2540_s20, %s2536_s19  ;;  %p111_p9 = scmp.eq.s32.totalorder %s2669_s17, 0 }
  0x1c   : > { %s224_s9 = scalar_lea.hbm %s3079_s2, %s2141_s30  ;;  %p162_p10 = scmp.eq.s32.totalorder %s2669_s17, 1 }
  0x1d   : > { %s225_s10 = sshll.u32 %s224_s9, 4  ;;  %p168_p11 = scmp.eq.s32.totalorder %s1555_s18, 1  ;;  %s226_s10 = int_to_ptr.hbm [resolvable:$true] %s225_s10 }
  0x1e   : > { %2296 = dma.hbm_to_vmem [thread:$0]  (!%p2659_p7), %s226_s10, 16384, %s228_s12, %s2663_s14, %s2559_s15, %s2559_s15, %s2560_s16  }
  0x1f   : > { %p1570_p12 = scmp.ge.s32.totalorder %s2556_s23, 1  ;;  %p2679_p13 = por %p111_p9, %p110_p8 }
  0x20   : > { %p2686_p0 = por %p162_p10, %p104_p1  ;;  %p2690_p2 = por %p168_p11, %p110_p8 }
  0x21   : > { %p175_p4 = scmp.lt.s32.totalorder %s2556_s23, 3  ;;  %s3084_s1 = sld [smem:[#allocation16_spill]] }
  0x22   : > { %s2561_s8 = smov [#allocation5]   ;;  %s1583_s10 = sshll.u32 %s210_s29, 1 }
  0x23   : > { %p2698_p5 = pnand %p1570_p12, %p175_p4  ;;  %s194_s9 = sshll.u32 %s2561_s8, 4  ;;  %s195_s9 = int_to_ptr.vmem [resolvable:$true] %s194_s9 }
  0x24   : > { %s1584_s11 = sshll.u32 %s2552_s0, 1  ;;  %s2562_s18 = smov 512  }
  0x25   : > { %p2289_p1 = pneg %p2698_p5  ;;  %s245_s16 = scalar_lea.hbm %s3074_s3, %s1584_s11 }
  0x26   : > { %s2563_s28 = smov 32   ;;  %s247_s30 = sshll.u32 %s245_s16, 4  ;;  %s248_s30 = int_to_ptr.hbm [resolvable:$true] %s247_s30 }
  0x27   : > { %s192_s6 = sshll.u32 %s3084_s1, 4  ;;  %p2290_p6 = pnand %p2289_p1, %p111_p9  ;;  %s193_s6 = int_to_ptr.hbm [resolvable:$true] %s192_s6 }
  0x28   : > { %s241_s1 = scalar_lea.vmem [#allocation10], %s1583_s10  ;;  %258 = sbr.rel (%p2698_p5) target bundleno = 360 (0x168), region = 32 }
  0x29   : > { %2292 = dma.hbm_to_vmem [thread:$0]  (!%p2290_p6), %s193_s6, 1024, %s195_s9, [#allocation6], %s2562_s18, %s2562_s18, %s2563_s28  }
  0x2a   : > { %s249_s2 = sshll.u32 %s241_s1, 4  ;;  %s250_s2 = int_to_ptr.vmem [resolvable:$true] %s249_s2 }
  0x2b   : > { %2299 = dma.hbm_to_vmem [thread:$0]  (!%p2659_p7), %s248_s30, 32, %s250_s2, %s2663_s14  }
  0x2d   : > { %2523 = dma.done.wait (%p111_p9), [#allocation6], 1024  }
  0x2e   : > { %2525 = vsyncadd (%p111_p9), [#allocation6], 4294966272  ;;  %s265_s29 = sand.u32 1, %s2669_s17   ;;  %s2723_s6 = sand.u32 1, %s2540_s20  }
  0x2f   : > { %s1587_s1 = sshll.u32 %s2723_s6, 10  ;;  %s266_s8 = scalar_lea.sflag [#allocation9], %s265_s29 }
  0x30   : > { %s2726_s13 = scalar_lea.vmem [#allocation8], %s1587_s1 }
  0x31   : > { %2527 = dma.done.wait (%p2679_p13), %s266_s8, 16416  }
  0x32   : > { %2529 = vsyncadd (%p2679_p13), %s266_s8, 4294950880  ;;  %s1588_s2 = sshll.u32 %s2723_s6, 1  ;;  %s1589_s14 = sshll.u32 %s2723_s6, 5  ;;  %v2564_v0 = vmov 0.0  }
  0x33   : > { %s328_s7 = sld [smem:[#allocation4 + %s2548_s22]]  ;;  %324 = vst [vmem:[#allocation2 + $0x10] sm:$0xff] %v2564_v0  ;;  %s2735_s17 = scalar_lea.vmem [#allocation10], %s1588_s2 }
  0x34   : > { %325 = vst [vmem:[#allocation2] sm:$0xff] %v2564_v0  ;;  %s2737_s9 = scalar_lea.vmem [#allocation11], %s1589_s14 }
  0x35   : > { %326 = vst [vmem:[#allocation2 + $0x18] sm:$0xff] %v2564_v0 }
  0x36   : > { %327 = vst [vmem:[#allocation2 + $0x8] sm:$0xff] %v2564_v0 }
  0x39   : > { %p1591_p7 = scmp.le.s32.totalorder %s328_s7, 0 }
  0x3b   : > { %332 = sbr.rel (%p1591_p7) target bundleno = 343 (0x157), region = 52 }
  0x40   : > { %v1682_v1 = vld [vmem:[%s2726_s13 + $0x70] sm:$0xf]  ;;  %v2165_v2 = vld [vmem:[%s2726_s13 + $0x74] sm:$0xf0]  ;;  %v1674_v12 = vld [vmem:[%s2726_s13 + $0x60] sm:$0xf] }
  0x41   : > { %v1746_v3 = vld [vmem:[%s2726_s13 + $0xf0] sm:$0xf]  ;;  %v1683_v4 = vor.u32 %v2165_v2, %v1682_v1  ;;  %v2181_v5 = vld [vmem:[%s2726_s13 + $0xf4] sm:$0xf0]  ;;  %v2163_v14 = vld [vmem:[%s2726_s13 + $0x64] sm:$0xf0] }
  0x42   : > { %v1810_v6 = vld [vmem:[%s2726_s13 + $0x170] sm:$0xf]  ;;  %v2197_v7 = vld [vmem:[%s2726_s13 + $0x174] sm:$0xf0]  ;;  %v1747_v8 = vor.u32 %v2181_v5, %v1746_v3  ;;  %v1738_v15 = vld [vmem:[%s2726_s13 + $0xe0] sm:$0xf]  ;;  %v1675_v17 = vor.u32 %v2163_v14, %v1674_v12 }
  0x43   : > { %v1811_v9 = vor.u32 %v2197_v7, %v1810_v6  ;;  %v1874_v10 = vld [vmem:[%s2726_s13 + $0x1f0] sm:$0xf]  ;;  %v2213_v11 = vld [vmem:[%s2726_s13 + $0x1f4] sm:$0xf0]  ;;  %1153 = vmatpush.bf16.msra.mxu0 %v1683_v4  ;;  %v2179_v16 = vld [vmem:[%s2726_s13 + $0xe4] sm:$0xf0] }
  0x44   : > { %v1875_v13 = vor.u32 %v2213_v11, %v1874_v10  ;;  %1167 = vmatpush.bf16.msra.mxu1 %v1747_v8  ;;  %v1739_v18 = vor.u32 %v2179_v16, %v1738_v15  ;;  %v1802_v19 = vld [vmem:[%s2726_s13 + $0x160] sm:$0xf]  ;;  %v2195_v20 = vld [vmem:[%s2726_s13 + $0x164] sm:$0xf0]  ;;  %v1666_v24 = vld [vmem:[%s2726_s13 + $0x50] sm:$0xf] }
  0x45   : > { %1181 = vmatpush.bf16.msra.mxu2 %v1811_v9  ;;  %v1866_v21 = vld [vmem:[%s2726_s13 + $0x1e0] sm:$0xf]  ;;  %v1803_v22 = vor.u32 %v2195_v20, %v1802_v19  ;;  %v2211_v23 = vld [vmem:[%s2726_s13 + $0x1e4] sm:$0xf0]  ;;  %v2161_v25 = vld [vmem:[%s2726_s13 + $0x54] sm:$0xf0] }
  0x46   : > { %1195 = vmatpush.bf16.msra.mxu3 %v1875_v13  ;;  %v1867_v26 = vor.u32 %v2211_v23, %v1866_v21  ;;  %v1730_v27 = vld [vmem:[%s2726_s13 + $0xd0] sm:$0xf]  ;;  %v2177_v28 = vld [vmem:[%s2726_s13 + $0xd4] sm:$0xf0]  ;;  %v1667_v30 = vor.u32 %v2161_v25, %v1666_v24  ;;  %v1658_v36 = vld [vmem:[%s2726_s13 + $0x40] sm:$0xf] }
  0x47   : > { %v1794_v29 = vld [vmem:[%s2726_s13 + $0x150] sm:$0xf]  ;;  %1154 = vmatpush.bf16.msra.mxu0 %v1675_v17  ;;  %v2193_v31 = vld [vmem:[%s2726_s13 + $0x154] sm:$0xf0]  ;;  %v1731_v34 = vor.u32 %v2177_v28, %v1730_v27  ;;  %v2159_v37 = vld [vmem:[%s2726_s13 + $0x44] sm:$0xf0] }
  0x48   : > { %v1858_v32 = vld [vmem:[%s2726_s13 + $0x1d0] sm:$0xf]  ;;  %v2209_v33 = vld [vmem:[%s2726_s13 + $0x1d4] sm:$0xf0]  ;;  %1168 = vmatpush.bf16.msra.mxu1 %v1739_v18  ;;  %v1795_v35 = vor.u32 %v2193_v31, %v1794_v29  ;;  %v1722_v38 = vld [vmem:[%s2726_s13 + $0xc0] sm:$0xf]  ;;  %v1659_v45 = vor.u32 %v2159_v37, %v1658_v36 }
  0x49   : > { %1182 = vmatpush.bf16.msra.mxu2 %v1803_v22  ;;  %v1859_v39 = vor.u32 %v2209_v33, %v1858_v32  ;;  %v2175_v40 = vld [vmem:[%s2726_s13 + $0xc4] sm:$0xf0]  ;;  %v1786_v41 = vld [vmem:[%s2726_s13 + $0x140] sm:$0xf]  ;;  %v1650_v48 = vld [vmem:[%s2726_s13 + $0x30] sm:$0xf] }
  0x4a   : > { %1196 = vmatpush.bf16.msra.mxu3 %v1867_v26  ;;  %v2191_v42 = vld [vmem:[%s2726_s13 + $0x144] sm:$0xf0]  ;;  %v1850_v43 = vld [vmem:[%s2726_s13 + $0x1c0] sm:$0xf]  ;;  %v1723_v46 = vor.u32 %v2175_v40, %v1722_v38  ;;  %v2157_v49 = vld [vmem:[%s2726_s13 + $0x34] sm:$0xf0] }
  0x4b   : > { %v2207_v44 = vld [vmem:[%s2726_s13 + $0x1c4] sm:$0xf0]  ;;  %1155 = vmatpush.bf16.msra.mxu0 %v1667_v30  ;;  %v1787_v47 = vor.u32 %v2191_v42, %v1786_v41  ;;  %v1714_v50 = vld [vmem:[%s2726_s13 + $0xb0] sm:$0xf]  ;;  %v2173_v52 = vld [vmem:[%s2726_s13 + $0xb4] sm:$0xf0]  ;;  %v1651_v57 = vor.u32 %v2157_v49, %v1650_v48 }
  0x4c   : > { %1169 = vmatpush.bf16.msra.mxu1 %v1731_v34  ;;  %v1851_v51 = vor.u32 %v2207_v44, %v1850_v43  ;;  %v1778_v53 = vld [vmem:[%s2726_s13 + $0x130] sm:$0xf]  ;;  %v2189_v54 = vld [vmem:[%s2726_s13 + $0x134] sm:$0xf0]  ;;  %v1715_v58 = vor.u32 %v2173_v52, %v1714_v50  ;;  %v1642_v60 = vld [vmem:[%s2726_s13 + $0x20] sm:$0xf] }
  0x4d   : > { %1183 = vmatpush.bf16.msra.mxu2 %v1795_v35  ;;  %v1842_v55 = vld [vmem:[%s2726_s13 + $0x1b0] sm:$0xf]  ;;  %v2205_v56 = vld [vmem:[%s2726_s13 + $0x1b4] sm:$0xf0]  ;;  %v1779_v59 = vor.u32 %v2189_v54, %v1778_v53  ;;  %v2155_v61 = vld [vmem:[%s2726_s13 + $0x24] sm:$0xf0] }
  0x4e   : > { %1197 = vmatpush.bf16.msra.mxu3 %v1859_v39  ;;  %v1706_v62 = vld [vmem:[%s2726_s13 + $0xa0] sm:$0xf]  ;;  %v1843_v63 = vor.u32 %v2205_v56, %v1842_v55  ;;  %v2171_v0 = vld [vmem:[%s2726_s13 + $0xa4] sm:$0xf0]  ;;  %v1643_v5 = vor.u32 %v2155_v61, %v1642_v60  ;;  %v1634_v8 = vld [vmem:[%s2726_s13 + $0x10] sm:$0xf] }
  0x4f   : > { %1156 = vmatpush.bf16.msra.mxu0 %v1659_v45  ;;  %v1770_v1 = vld [vmem:[%s2726_s13 + $0x120] sm:$0xf]  ;;  %v2187_v2 = vld [vmem:[%s2726_s13 + $0x124] sm:$0xf0]  ;;  %v1707_v6 = vor.u32 %v2171_v0, %v1706_v62  ;;  %v2153_v9 = vld [vmem:[%s2726_s13 + $0x14] sm:$0xf0] }
  0x50   : > { %1170 = vmatpush.bf16.msra.mxu1 %v1723_v46  ;;  %v1834_v3 = vld [vmem:[%s2726_s13 + $0x1a0] sm:$0xf]  ;;  %v2203_v4 = vld [vmem:[%s2726_s13 + $0x1a4] sm:$0xf0]  ;;  %v1771_v7 = vor.u32 %v2187_v2, %v1770_v1  ;;  %v1698_v10 = vld [vmem:[%s2726_s13 + $0x90] sm:$0xf]  ;;  %v1635_v17 = vor.u32 %v2153_v9, %v1634_v8 }
  0x51   : > { %1184 = vmatpush.bf16.msra.mxu2 %v1787_v47  ;;  %v1835_v11 = vor.u32 %v2203_v4, %v1834_v3  ;;  %v2169_v12 = vld [vmem:[%s2726_s13 + $0x94] sm:$0xf0]  ;;  %v1762_v13 = vld [vmem:[%s2726_s13 + $0x110] sm:$0xf]  ;;  %v1626_v18 = vld [vmem:[%s2726_s13] sm:$0xf] }
  0x52   : > { %1198 = vmatpush.bf16.msra.mxu3 %v1851_v51  ;;  %v2185_v14 = vld [vmem:[%s2726_s13 + $0x114] sm:$0xf0]  ;;  %v1826_v15 = vld [vmem:[%s2726_s13 + $0x190] sm:$0xf]  ;;  %v2151_v19 = vld [vmem:[%s2726_s13 + $0x4] sm:$0xf0]  ;;  %v1699_v20 = vor.u32 %v2169_v12, %v1698_v10 }
  0x53   : > { %1157 = vmatpush.bf16.msra.mxu0 %v1651_v57  ;;  %v2201_v16 = vld [vmem:[%s2726_s13 + $0x194] sm:$0xf0]  ;;  %v1763_v21 = vor.u32 %v2185_v14, %v1762_v13  ;;  %v1690_v22 = vld [vmem:[%s2726_s13 + $0x80] sm:$0xf]  ;;  %v2167_v23 = vld [vmem:[%s2726_s13 + $0x84] sm:$0xf0]  ;;  %v1627_v32 = vor.u32 %v2151_v19, %v1626_v18 }
  0x54   : > { %1171 = vmatpush.bf16.msra.mxu1 %v1715_v58  ;;  %v1754_v24 = vld [vmem:[%s2726_s13 + $0x100] sm:$0xf]  ;;  %v1827_v25 = vor.u32 %v2201_v16, %v1826_v15  ;;  %v2183_v26 = vld [vmem:[%s2726_s13 + $0x104] sm:$0xf0]  ;;  %v1938_v29 = vld [vmem:[%s2726_s13 + $0x270] sm:$0xf]  ;;  %v1691_v36 = vor.u32 %v2167_v23, %v1690_v22 }
  0x55   : > { %1185 = vmatpush.bf16.msra.mxu2 %v1779_v59  ;;  %v1818_v27 = vld [vmem:[%s2726_s13 + $0x180] sm:$0xf]  ;;  %v2199_v28 = vld [vmem:[%s2726_s13 + $0x184] sm:$0xf0]  ;;  %v2229_v30 = vld [vmem:[%s2726_s13 + $0x274] sm:$0xf0]  ;;  %v1755_v37 = vor.u32 %v2183_v26, %v1754_v24 }
  0x56   : > { %1199 = vmatpush.bf16.msra.mxu3 %v1843_v63  ;;  %v2002_v31 = vld [vmem:[%s2726_s13 + $0x2f0] sm:$0xf]  ;;  %v2245_v33 = vld [vmem:[%s2726_s13 + $0x2f4] sm:$0xf0]  ;;  %v1819_v40 = vor.u32 %v2199_v28, %v1818_v27  ;;  %v1939_v41 = vor.u32 %v2229_v30, %v1938_v29  ;;  %v1930_v42 = vld [vmem:[%s2726_s13 + $0x260] sm:$0xf] }
  0x57   : > { %1158 = vmatpush.bf16.msra.mxu0 %v1643_v5  ;;  %v2066_v34 = vld [vmem:[%s2726_s13 + $0x370] sm:$0xf]  ;;  %v2261_v35 = vld [vmem:[%s2726_s13 + $0x374] sm:$0xf0]  ;;  %v2227_v43 = vld [vmem:[%s2726_s13 + $0x264] sm:$0xf0]  ;;  %v2003_v44 = vor.u32 %v2245_v33, %v2002_v31 }
  0x58   : > { %1172 = vmatpush.bf16.msra.mxu1 %v1707_v6  ;;  %v2130_v38 = vld [vmem:[%s2726_s13 + $0x3f0] sm:$0xf]  ;;  %v2277_v39 = vld [vmem:[%s2726_s13 + $0x3f4] sm:$0xf0]  ;;  %v2067_v45 = vor.u32 %v2261_v35, %v2066_v34  ;;  %v1994_v46 = vld [vmem:[%s2726_s13 + $0x2e0] sm:$0xf]  ;;  %v1931_v56 = vor.u32 %v2227_v43, %v1930_v42 }
  0x59   : > { %1186 = vmatpush.bf16.msra.mxu2 %v1771_v7  ;;  %v2243_v47 = vld [vmem:[%s2726_s13 + $0x2e4] sm:$0xf0]  ;;  %v2058_v48 = vld [vmem:[%s2726_s13 + $0x360] sm:$0xf]  ;;  %v2131_v49 = vor.u32 %v2277_v39, %v2130_v38  ;;  %v1922_v57 = vld [vmem:[%s2726_s13 + $0x250] sm:$0xf] }
  0x5a   : > { %1200 = vmatpush.bf16.msra.mxu3 %v1835_v11  ;;  %v2259_v50 = vld [vmem:[%s2726_s13 + $0x364] sm:$0xf0]  ;;  %v2122_v51 = vld [vmem:[%s2726_s13 + $0x3e0] sm:$0xf]  ;;  %v2225_v58 = vld [vmem:[%s2726_s13 + $0x254] sm:$0xf0]  ;;  %v1995_v61 = vor.u32 %v2243_v47, %v1994_v46 }
  0x5b   : > { %1159 = vmatpush.bf16.msra.mxu0 %v1635_v17  ;;  %v2275_v52 = vld [vmem:[%s2726_s13 + $0x3e4] sm:$0xf0]  ;;  %v1594_v53 = vld [vmem:[#allocation5] sm:$0xf]  ;;  %v2059_v62 = vor.u32 %v2259_v50, %v2058_v48  ;;  %v1986_v63 = vld [vmem:[%s2726_s13 + $0x2d0] sm:$0xf]  ;;  %v1923_v10 = vor.u32 %v2225_v58, %v1922_v57 }
  0x5c   : > { %1173 = vmatpush.bf16.msra.mxu1 %v1699_v20  ;;  %v2146_v54 = vld [vmem:[#allocation5 + $0x1c] sm:$0xf0]  ;;  %v1602_v55 = vld [vmem:[#allocation5 + $0x8] sm:$0xf]  ;;  %v2241_v0 = vld [vmem:[%s2726_s13 + $0x2d4] sm:$0xf0]  ;;  %v2123_v3 = vor.u32 %v2275_v52, %v2122_v51 }
  0x5d   : > { %1187 = vmatpush.bf16.msra.mxu2 %v1763_v21  ;;  %v2821_v59 = vor.u32 %v2146_v54, %v1594_v53  ;;  %v2147_v60 = vld [vmem:[#allocation5 + $0x24] sm:$0xf0]  ;;  %v2050_v1 = vld [vmem:[%s2726_s13 + $0x350] sm:$0xf]  ;;  %v2257_v4 = vld [vmem:[%s2726_s13 + $0x354] sm:$0xf0]  ;;  %v1987_v13 = vor.u32 %v2241_v0, %v1986_v63 }
  0x5e   : > { %1201 = vmatpush.bf16.msra.mxu3 %v1827_v25  ;;  %v2826_v2 = vor.u32 %v2147_v60, %v1602_v55  ;;  %v2114_v5 = vld [vmem:[%s2726_s13 + $0x3d0] sm:$0xf]  ;;  %v2273_v6 = vld [vmem:[%s2726_s13 + $0x3d4] sm:$0xf0]  ;;  %v2142_v7 = vld [vmem:[#allocation5 + $0x4] sm:$0xf]  ;;  %v2051_v14 = vor.u32 %v2257_v4, %v2050_v1 }
  0x5f   : > { %1160 = vmatpush.bf16.msra.mxu0 %v1627_v32  ;;  %v1596_v8 = vld [vmem:[#allocation5 + $0x20] sm:$0xf0]  ;;  %v2143_v9 = vld [vmem:[#allocation5 + $0xc] sm:$0xf]  ;;  %v1914_v15 = vld [vmem:[%s2726_s13 + $0x240] sm:$0xf]  ;;  %v2115_v19 = vor.u32 %v2273_v6, %v2114_v5 }
  0x60   : > { %1174 = vmatpush.bf16.msra.mxu1 %v1691_v36  ;;  %v2833_v11 = vor.u32 %v2142_v7, %v1596_v8  ;;  %v1604_v12 = vld [vmem:[#allocation5 + $0x28] sm:$0xf0]  ;;  %v2223_v16 = vld [vmem:[%s2726_s13 + $0x244] sm:$0xf0]  ;;  %v1978_v17 = vld [vmem:[%s2726_s13 + $0x2c0] sm:$0xf] }
  0x61   : > { %1188 = vmatpush.bf16.msra.mxu2 %v1755_v37  ;;  %v2838_v18 = vor.u32 %v2143_v9, %v1604_v12  ;;  %v2239_v20 = vld [vmem:[%s2726_s13 + $0x2c4] sm:$0xf0]  ;;  %v2042_v21 = vld [vmem:[%s2726_s13 + $0x340] sm:$0xf]  ;;  %v1915_v25 = vor.u32 %v2223_v16, %v1914_v15  ;;  %v1906_v28 = vld [vmem:[%s2726_s13 + $0x230] sm:$0xf] }
  0x62   : > { %1202 = vmatpush.bf16.msra.mxu3 %v1819_v40  ;;  %1161 = vmatmul.bf16.vlgmr.msra.gmra.mxu0 %v2821_v59  ;;  %v2255_v22 = vld [vmem:[%s2726_s13 + $0x344] sm:$0xf0]  ;;  %v2106_v23 = vld [vmem:[%s2726_s13 + $0x3c0] sm:$0xf]  ;;  %v1979_v26 = vor.u32 %v2239_v20, %v1978_v17  ;;  %v2221_v29 = vld [vmem:[%s2726_s13 + $0x234] sm:$0xf0] }
  0x63   : > { %1209 = vmatpush.bf16.msrb.mxu0 %v1939_v41  ;;  %1175 = vmatmul.bf16.vlgmr.msra.gmra.mxu1 %v2833_v11  ;;  %v2271_v24 = vld [vmem:[%s2726_s13 + $0x3c4] sm:$0xf0]  ;;  %v2043_v27 = vor.u32 %v2255_v22, %v2042_v21  ;;  %v1970_v30 = vld [vmem:[%s2726_s13 + $0x2b0] sm:$0xf]  ;;  %v2237_v32 = vld [vmem:[%s2726_s13 + $0x2b4] sm:$0xf0]  ;;  %v1907_v37 = vor.u32 %v2221_v29, %v1906_v28 }
  0x64   : > { %1223 = vmatpush.bf16.msrb.mxu1 %v2003_v44  ;;  %1189 = vmatmul.bf16.vlgmr.msra.gmra.mxu2 %v2826_v2  ;;  %v2107_v31 = vor.u32 %v2271_v24, %v2106_v23  ;;  %v2034_v33 = vld [vmem:[%s2726_s13 + $0x330] sm:$0xf]  ;;  %v2253_v34 = vld [vmem:[%s2726_s13 + $0x334] sm:$0xf0]  ;;  %v1971_v38 = vor.u32 %v2237_v32, %v1970_v30  ;;  %v1898_v40 = vld [vmem:[%s2726_s13 + $0x220] sm:$0xf] }
  0x65   : > { %1237 = vmatpush.bf16.msrb.mxu2 %v2067_v45  ;;  %1203 = vmatmul.bf16.vlgmr.msra.gmra.mxu3 %v2838_v18  ;;  %v2098_v35 = vld [vmem:[%s2726_s13 + $0x3b0] sm:$0xf]  ;;  %v2269_v36 = vld [vmem:[%s2726_s13 + $0x3b4] sm:$0xf0]  ;;  %v2035_v39 = vor.u32 %v2253_v34, %v2034_v33  ;;  %v2219_v41 = vld [vmem:[%s2726_s13 + $0x224] sm:$0xf0] }
  0x66   : > { %1251 = vmatpush.bf16.msrb.mxu3 %v2131_v49  ;;  %v1962_v42 = vld [vmem:[%s2726_s13 + $0x2a0] sm:$0xf]  ;;  %v2099_v43 = vor.u32 %v2269_v36, %v2098_v35  ;;  %v2235_v44 = vld [vmem:[%s2726_s13 + $0x2a4] sm:$0xf0]  ;;  %v1899_v49 = vor.u32 %v2219_v41, %v1898_v40  ;;  %v1890_v50 = vld [vmem:[%s2726_s13 + $0x210] sm:$0xf] }
  0x67   : > { %1210 = vmatpush.bf16.msrb.mxu0 %v1931_v56  ;;  %v2026_v45 = vld [vmem:[%s2726_s13 + $0x320] sm:$0xf]  ;;  %v2251_v46 = vld [vmem:[%s2726_s13 + $0x324] sm:$0xf0]  ;;  %v1963_v51 = vor.u32 %v2235_v44, %v1962_v42  ;;  %v2217_v53 = vld [vmem:[%s2726_s13 + $0x214] sm:$0xf0] }
  0x68   : > { %1224 = vmatpush.bf16.msrb.mxu1 %v1995_v61  ;;  %v2090_v47 = vld [vmem:[%s2726_s13 + $0x3a0] sm:$0xf]  ;;  %v2267_v48 = vld [vmem:[%s2726_s13 + $0x3a4] sm:$0xf0]  ;;  %v2027_v52 = vor.u32 %v2251_v46, %v2026_v45  ;;  %v1954_v54 = vld [vmem:[%s2726_s13 + $0x290] sm:$0xf]  ;;  %v1891_v0 = vor.u32 %v2217_v53, %v1890_v50 }
  0x69   : > { %1238 = vmatpush.bf16.msrb.mxu2 %v2059_v62  ;;  %v2233_v55 = vld [vmem:[%s2726_s13 + $0x294] sm:$0xf0]  ;;  %v2091_v56 = vor.u32 %v2267_v48, %v2090_v47  ;;  %v2018_v57 = vld [vmem:[%s2726_s13 + $0x310] sm:$0xf]  ;;  %v1882_v62 = vld [vmem:[%s2726_s13 + $0x200] sm:$0xf] }
  0x6a   : > { %1252 = vmatpush.bf16.msrb.mxu3 %v2123_v3  ;;  %v2249_v58 = vld [vmem:[%s2726_s13 + $0x314] sm:$0xf0]  ;;  %v2082_v60 = vld [vmem:[%s2726_s13 + $0x390] sm:$0xf]  ;;  %v2215_v63 = vld [vmem:[%s2726_s13 + $0x204] sm:$0xf0]  ;;  %v1955_v6 = vor.u32 %v2233_v55, %v1954_v54 }
  0x6b   : > { %1211 = vmatpush.bf16.msrb.mxu0 %v1923_v10  ;;  %v2265_v61 = vld [vmem:[%s2726_s13 + $0x394] sm:$0xf0]  ;;  %v1946_v1 = vld [vmem:[%s2726_s13 + $0x280] sm:$0xf]  ;;  %v2231_v3 = vld [vmem:[%s2726_s13 + $0x284] sm:$0xf0]  ;;  %v2019_v7 = vor.u32 %v2249_v58, %v2018_v57  ;;  %v1883_v20 = vor.u32 %v2215_v63, %v1882_v62 }
  0x6c   : > { %1225 = vmatpush.bf16.msrb.mxu1 %v1987_v13  ;;  %v2010_v4 = vld [vmem:[%s2726_s13 + $0x300] sm:$0xf]  ;;  %v2247_v5 = vld [vmem:[%s2726_s13 + $0x304] sm:$0xf0]  ;;  %v2164_v10 = vld [vmem:[%s2726_s13 + $0x74] sm:$0xf]  ;;  %v2083_v12 = vor.u32 %v2265_v61, %v2082_v60  ;;  %v1947_v24 = vor.u32 %v2231_v3, %v1946_v1 }
  0x6d   : > { %1239 = vmatpush.bf16.msrb.mxu2 %v2051_v14  ;;  %v2074_v8 = vld [vmem:[%s2726_s13 + $0x380] sm:$0xf]  ;;  %v2263_v9 = vld [vmem:[%s2726_s13 + $0x384] sm:$0xf0]  ;;  %v1684_v13 = vld [vmem:[%s2726_s13 + $0x78] sm:$0xf0] }
  0x6e   : > { %1253 = vmatpush.bf16.msrb.mxu3 %v2115_v19  ;;  %v2180_v14 = vld [vmem:[%s2726_s13 + $0xf4] sm:$0xf]  ;;  %v1748_v15 = vld [vmem:[%s2726_s13 + $0xf8] sm:$0xf0]  ;;  %v1610_v22 = vld [vmem:[#allocation5 + $0x10] sm:$0xf]  ;;  %v2075_v29 = vor.u32 %v2263_v9, %v2074_v8  ;;  %v1687_v30 = vor.u32 %v2164_v10, %v1684_v13 }
  0x6f   : > { %1212 = vmatpush.bf16.msrb.mxu0 %v1915_v25  ;;  %v2196_v16 = vld [vmem:[%s2726_s13 + $0x174] sm:$0xf]  ;;  %v1812_v17 = vld [vmem:[%s2726_s13 + $0x178] sm:$0xf0]  ;;  %v2148_v23 = vld [vmem:[#allocation5 + $0x2c] sm:$0xf0]  ;;  %v2011_v25 = vor.u32 %v2247_v5, %v2010_v4  ;;  %v1751_v34 = vor.u32 %v2180_v14, %v1748_v15 }
  0x70   : > { %1226 = vmatpush.bf16.msrb.mxu1 %v1979_v26  ;;  %v2212_v19 = vld [vmem:[%s2726_s13 + $0x1f4] sm:$0xf]  ;;  %v1876_v21 = vld [vmem:[%s2726_s13 + $0x1f8] sm:$0xf0]  ;;  %v1618_v26 = vld [vmem:[#allocation5 + $0x18] sm:$0xf]  ;;  %v1815_v35 = vor.u32 %v2196_v16, %v1812_v17  ;;  %v2890_v40 = vor.u32 %v2148_v23, %v1610_v22 }
  0x71   : > { %1240 = vmatpush.bf16.msrb.mxu2 %v2043_v27  ;;  %v2149_v27 = vld [vmem:[#allocation5 + $0x34] sm:$0xf0]  ;;  %v2144_v28 = vld [vmem:[#allocation5 + $0x14] sm:$0xf]  ;;  %v2145_v32 = vld [vmem:[#allocation5 + $0x1c] sm:$0xf] }
  0x72   : > { %1254 = vmatpush.bf16.msrb.mxu3 %v2107_v31  ;;  %v1612_v31 = vld [vmem:[#allocation5 + $0x30] sm:$0xf0]  ;;  %v1620_v33 = vld [vmem:[#allocation5 + $0x38] sm:$0xf0]  ;;  %v2162_v36 = vld [vmem:[%s2726_s13 + $0x64] sm:$0xf]  ;;  %v2895_v44 = vor.u32 %v2149_v27, %v1618_v26 }
  0x73   : > { %1213 = vmatpush.bf16.msrb.mxu0 %v1907_v37  ;;  %v1676_v37 = vld [vmem:[%s2726_s13 + $0x68] sm:$0xf0]  ;;  %v2194_v42 = vld [vmem:[%s2726_s13 + $0x164] sm:$0xf]  ;;  %v2897_v45 = vor.u32 %v2144_v28, %v1612_v31  ;;  %v2901_v48 = vor.u32 %v2145_v32, %v1620_v33  ;;  %v1668_v53 = vld [vmem:[%s2726_s13 + $0x58] sm:$0xf0] }
  0x74   : > { %1227 = vmatpush.bf16.msrb.mxu1 %v1971_v38  ;;  %v2178_v38 = vld [vmem:[%s2726_s13 + $0xe4] sm:$0xf]  ;;  %v1740_v41 = vld [vmem:[%s2726_s13 + $0xe8] sm:$0xf0]  ;;  %v2176_v54 = vld [vmem:[%s2726_s13 + $0xd4] sm:$0xf] }
  0x75   : > { %1241 = vmatpush.bf16.msrb.mxu2 %v2035_v39  ;;  %v1879_v39 = vor.u32 %v2212_v19, %v1876_v21  ;;  %v2210_v46 = vld [vmem:[%s2726_s13 + $0x1e4] sm:$0xf]  ;;  %v1868_v47 = vld [vmem:[%s2726_s13 + $0x1e8] sm:$0xf0]  ;;  %v1743_v50 = vor.u32 %v2178_v38, %v1740_v41  ;;  %v2192_v57 = vld [vmem:[%s2726_s13 + $0x154] sm:$0xf] }
  0x76   : > { %1255 = vmatpush.bf16.msrb.mxu3 %v2099_v43  ;;  %v1804_v43 = vld [vmem:[%s2726_s13 + $0x168] sm:$0xf0]  ;;  %v1871_v55 = vor.u32 %v2210_v46, %v1868_v47  ;;  %v1796_v58 = vld [vmem:[%s2726_s13 + $0x158] sm:$0xf0]  ;;  %v2208_v60 = vld [vmem:[%s2726_s13 + $0x1d4] sm:$0xf] }
  0x77   : > { %1214 = vmatpush.bf16.msrb.mxu0 %v1899_v49  ;;  %v1679_v49 = vor.u32 %v2162_v36, %v1676_v37  ;;  %v1860_v61 = vld [vmem:[%s2726_s13 + $0x1d8] sm:$0xf0]  ;;  %v2158_v1 = vld [vmem:[%s2726_s13 + $0x44] sm:$0xf]  ;;  %v1660_v3 = vld [vmem:[%s2726_s13 + $0x48] sm:$0xf0] }
  0x78   : > { %1228 = vmatpush.bf16.msrb.mxu1 %v1963_v51  ;;  %v1807_v51 = vor.u32 %v2194_v42, %v1804_v43  ;;  %v2174_v4 = vld [vmem:[%s2726_s13 + $0xc4] sm:$0xf]  ;;  %v1863_v5 = vor.u32 %v2208_v60, %v1860_v61  ;;  %v1788_v8 = vld [vmem:[%s2726_s13 + $0x148] sm:$0xf0]  ;;  %v2156_v15 = vld [vmem:[%s2726_s13 + $0x34] sm:$0xf] }
  0x79   : > { %1242 = vmatpush.bf16.msrb.mxu2 %v2027_v52  ;;  %v2160_v52 = vld [vmem:[%s2726_s13 + $0x54] sm:$0xf]  ;;  %v2206_v9 = vld [vmem:[%s2726_s13 + $0x1c4] sm:$0xf]  ;;  %v1852_v10 = vld [vmem:[%s2726_s13 + $0x1c8] sm:$0xf0] }
  0x7a   : > { %1256 = vmatpush.bf16.msrb.mxu3 %v2091_v56  ;;  %v1732_v56 = vld [vmem:[%s2726_s13 + $0xd8] sm:$0xf0]  ;;  %v1671_v62 = vor.u32 %v2160_v52, %v1668_v53  ;;  %v2172_v17 = vld [vmem:[%s2726_s13 + $0xb4] sm:$0xf]  ;;  %v1855_v19 = vor.u32 %v2206_v9, %v1852_v10  ;;  %v2154_v28 = vld [vmem:[%s2726_s13 + $0x24] sm:$0xf] }
  0x7b   : > { %1215 = vmatpush.bf16.msrb.mxu0 %v1891_v0  ;;  %v1735_v63 = vor.u32 %v2176_v54, %v1732_v56  ;;  %v1799_v0 = vor.u32 %v2192_v57, %v1796_v58  ;;  %v1652_v16 = vld [vmem:[%s2726_s13 + $0x38] sm:$0xf0]  ;;  %v2188_v21 = vld [vmem:[%s2726_s13 + $0x134] sm:$0xf]  ;;  %v1708_v32 = vld [vmem:[%s2726_s13 + $0xa8] sm:$0xf0] }
  0x7c   : > { %1229 = vmatpush.bf16.msrb.mxu1 %v1955_v6  ;;  %v1724_v6 = vld [vmem:[%s2726_s13 + $0xc8] sm:$0xf0]  ;;  %v1780_v22 = vld [vmem:[%s2726_s13 + $0x138] sm:$0xf0]  ;;  %v2204_v23 = vld [vmem:[%s2726_s13 + $0x1b4] sm:$0xf] }
  0x7d   : > { %1243 = vmatpush.bf16.msrb.mxu2 %v2019_v7  ;;  %v2190_v7 = vld [vmem:[%s2726_s13 + $0x144] sm:$0xf]  ;;  %v1727_v13 = vor.u32 %v2174_v4, %v1724_v6  ;;  %v1783_v27 = vor.u32 %v2188_v21, %v1780_v22  ;;  %v1836_v36 = vld [vmem:[%s2726_s13 + $0x1a8] sm:$0xf0]  ;;  %v2152_v41 = vld [vmem:[%s2726_s13 + $0x14] sm:$0xf] }
  0x7e   : > { %1257 = vmatpush.bf16.msrb.mxu3 %v2083_v12  ;;  %v1663_v12 = vor.u32 %v2158_v1, %v1660_v3  ;;  %v1791_v14 = vor.u32 %v2190_v7, %v1788_v8  ;;  %v2186_v33 = vld [vmem:[%s2726_s13 + $0x124] sm:$0xf]  ;;  %v1636_v42 = vld [vmem:[%s2726_s13 + $0x18] sm:$0xf0]  ;;  %v2168_v43 = vld [vmem:[%s2726_s13 + $0x94] sm:$0xf] }
  0x7f   : > { %1216 = vmatpush.bf16.msrb.mxu0 %v1883_v20  ;;  %v1716_v20 = vld [vmem:[%s2726_s13 + $0xb8] sm:$0xf0]  ;;  %v1639_v53 = vor.u32 %v2152_v41, %v1636_v42  ;;  %v2150_v54 = vld [vmem:[%s2726_s13 + $0x4] sm:$0xf]  ;;  %v1692_v60 = vld [vmem:[%s2726_s13 + $0x88] sm:$0xf0] }
  0x80   : > { %1230 = vmatpush.bf16.msrb.mxu1 %v1947_v24  ;;  %v1844_v24 = vld [vmem:[%s2726_s13 + $0x1b8] sm:$0xf0]  ;;  %v1719_v26 = vor.u32 %v2172_v17, %v1716_v20  ;;  %v2166_v58 = vld [vmem:[%s2726_s13 + $0x84] sm:$0xf]  ;;  %v1820_v1 = vld [vmem:[%s2726_s13 + $0x188] sm:$0xf0] }
  0x81   : > { %1244 = vmatpush.bf16.msrb.mxu2 %v2011_v25  ;;  %v1655_v25 = vor.u32 %v2156_v15, %v1652_v16  ;;  %v1847_v31 = vor.u32 %v2204_v23, %v1844_v24  ;;  %v1700_v47 = vld [vmem:[%s2726_s13 + $0x98] sm:$0xf0]  ;;  %v2182_v61 = vld [vmem:[%s2726_s13 + $0x104] sm:$0xf]  ;;  %v2228_v3 = vld [vmem:[%s2726_s13 + $0x274] sm:$0xf]  ;;  %v1695_v10 = vor.u32 %v2166_v58, %v1692_v60 }
  0x82   : > { %1258 = vmatpush.bf16.msrb.mxu3 %v2075_v29  ;;  %1217 = vmatmul.bf16.vlgmr.msrb.gmra.mxu0 %v2890_v40  ;;  %v1644_v29 = vld [vmem:[%s2726_s13 + $0x28] sm:$0xf0]  ;;  %v1828_v52 = vld [vmem:[%s2726_s13 + $0x198] sm:$0xf0]  ;;  %v1703_v56 = vor.u32 %v2168_v43, %v1700_v47  ;;  %v2260_v8 = vld [vmem:[%s2726_s13 + $0x374] sm:$0xf] }
  0x83   : > { %1265 = vmatpush.bf16.msra.mxu0 %v1687_v30  ;;  %1231 = vmatmul.bf16.vlgmr.msrb.gmra.mxu1 %v2897_v45  ;;  %v2170_v30 = vld [vmem:[%s2726_s13 + $0xa4] sm:$0xf]  ;;  %v1647_v37 = vor.u32 %v2154_v28, %v1644_v29  ;;  %v1940_v4 = vld [vmem:[%s2726_s13 + $0x278] sm:$0xf0]  ;;  %v1932_v21 = vld [vmem:[%s2726_s13 + $0x268] sm:$0xf0] }
  0x84   : > { %1279 = vmatpush.bf16.msra.mxu1 %v1751_v34  ;;  %1245 = vmatmul.bf16.vlgmr.msrb.gmra.mxu2 %v2895_v44  ;;  %v1772_v34 = vld [vmem:[%s2726_s13 + $0x128] sm:$0xf0]  ;;  %v1711_v38 = vor.u32 %v2170_v30, %v1708_v32  ;;  %v2004_v7 = vld [vmem:[%s2726_s13 + $0x2f8] sm:$0xf0]  ;;  %v1943_v16 = vor.u32 %v2228_v3, %v1940_v4  ;;  %v2226_v20 = vld [vmem:[%s2726_s13 + $0x264] sm:$0xf] }
  0x85   : > { %1293 = vmatpush.bf16.msra.mxu2 %v1815_v35  ;;  %1259 = vmatmul.bf16.vlgmr.msrb.gmra.mxu3 %v2901_v48  ;;  %v2202_v35 = vld [vmem:[%s2726_s13 + $0x1a4] sm:$0xf]  ;;  %v2068_v9 = vld [vmem:[%s2726_s13 + $0x378] sm:$0xf0]  ;;  %v1996_v24 = vld [vmem:[%s2726_s13 + $0x2e8] sm:$0xf0]  ;;  %v1935_v29 = vor.u32 %v2226_v20, %v1932_v21 }
  0x86   : > { %1307 = vmatpush.bf16.msra.mxu3 %v1879_v39  ;;  %v1775_v39 = vor.u32 %v2186_v33, %v1772_v34  ;;  %v1839_v46 = vor.u32 %v2202_v35, %v1836_v36  ;;  %v2242_v22 = vld [vmem:[%s2726_s13 + $0x2e4] sm:$0xf]  ;;  %v2124_v28 = vld [vmem:[%s2726_s13 + $0x3e8] sm:$0xf0]  ;;  %v2224_v32 = vld [vmem:[%s2726_s13 + $0x254] sm:$0xf] }
  0x87   : > { %1266 = vmatpush.bf16.msra.mxu0 %v1679_v49  ;;  %v2184_v49 = vld [vmem:[%s2726_s13 + $0x114] sm:$0xf]  ;;  %v1999_v30 = vor.u32 %v2242_v22, %v1996_v24  ;;  %v1924_v33 = vld [vmem:[%s2726_s13 + $0x258] sm:$0xf0]  ;;  %v2238_v47 = vld [vmem:[%s2726_s13 + $0x2c4] sm:$0xf] }
  0x88   : > { %1280 = vmatpush.bf16.msra.mxu1 %v1743_v50  ;;  %v1764_v50 = vld [vmem:[%s2726_s13 + $0x118] sm:$0xf0]  ;;  %v2240_v34 = vld [vmem:[%s2726_s13 + $0x2d4] sm:$0xf]  ;;  %v1927_v42 = vor.u32 %v2224_v32, %v1924_v33  ;;  %v2214_v32 = vld [vmem:[%s2726_s13 + $0x204] sm:$0xf] }
  0x89   : > { %1294 = vmatpush.bf16.msra.mxu2 %v1807_v51  ;;  %v2200_v51 = vld [vmem:[%s2726_s13 + $0x194] sm:$0xf]  ;;  %v1767_v57 = vor.u32 %v2184_v49, %v1764_v50  ;;  %v1988_v36 = vld [vmem:[%s2726_s13 + $0x2d8] sm:$0xf0]  ;;  %v1980_v50 = vld [vmem:[%s2726_s13 + $0x2c8] sm:$0xf0] }
  0x8a   : > { %1308 = vmatpush.bf16.msra.mxu3 %v1871_v55  ;;  %v1628_v55 = vld [vmem:[%s2726_s13 + $0x8] sm:$0xf0]  ;;  %v2116_v41 = vld [vmem:[%s2726_s13 + $0x3d8] sm:$0xf0]  ;;  %v2236_v58 = vld [vmem:[%s2726_s13 + $0x2b4] sm:$0xf] }
  0x8b   : > { %1267 = vmatpush.bf16.msra.mxu0 %v1671_v62  ;;  %v1831_v62 = vor.u32 %v2200_v51, %v1828_v52  ;;  %v1631_v6 = vor.u32 %v2150_v54, %v1628_v55  ;;  %v2044_v51 = vld [vmem:[%s2726_s13 + $0x348] sm:$0xf0]  ;;  %v2270_v52 = vld [vmem:[%s2726_s13 + $0x3c4] sm:$0xf]  ;;  %v1983_v54 = vor.u32 %v2238_v47, %v1980_v50  ;;  %v2216_v20 = vld [vmem:[%s2726_s13 + $0x214] sm:$0xf] }
  0x8c   : > { %1281 = vmatpush.bf16.msra.mxu1 %v1735_v63  ;;  %v1756_v63 = vld [vmem:[%s2726_s13 + $0x108] sm:$0xf0]  ;;  %v1892_v21 = vld [vmem:[%s2726_s13 + $0x218] sm:$0xf0]  ;;  %v2232_v22 = vld [vmem:[%s2726_s13 + $0x294] sm:$0xf] }
  0x8d   : > { %1295 = vmatpush.bf16.msra.mxu2 %v1799_v0  ;;  %v2198_v0 = vld [vmem:[%s2726_s13 + $0x184] sm:$0xf]  ;;  %v1956_v24 = vld [vmem:[%s2726_s13 + $0x298] sm:$0xf0]  ;;  %v1884_v33 = vld [vmem:[%s2726_s13 + $0x208] sm:$0xf0] }
  0x8e   : > { %1309 = vmatpush.bf16.msra.mxu3 %v1863_v5  ;;  %v2244_v5 = vld [vmem:[%s2726_s13 + $0x2f4] sm:$0xf]  ;;  %v1823_v15 = vor.u32 %v2198_v0, %v1820_v1  ;;  %v2100_v1 = vld [vmem:[%s2726_s13 + $0x3b8] sm:$0xf0] }
  0x8f   : > { %1268 = vmatpush.bf16.msra.mxu0 %v1663_v12  ;;  %v1759_v12 = vor.u32 %v2182_v61, %v1756_v63  ;;  %v2007_v17 = vor.u32 %v2244_v5, %v2004_v7  ;;  %v1972_v61 = vld [vmem:[%s2726_s13 + $0x2b8] sm:$0xf0]  ;;  %v2268_v0 = vld [vmem:[%s2726_s13 + $0x3b4] sm:$0xf]  ;;  %v1900_v7 = vld [vmem:[%s2726_s13 + $0x228] sm:$0xf0] }
  0x90   : > { %1282 = vmatpush.bf16.msra.mxu1 %v1727_v13  ;;  %v2276_v13 = vld [vmem:[%s2726_s13 + $0x3f4] sm:$0xf]  ;;  %v2036_v63 = vld [vmem:[%s2726_s13 + $0x338] sm:$0xf0]  ;;  %v1975_v4 = vor.u32 %v2236_v58, %v1972_v61 }
  0x91   : > { %1296 = vmatpush.bf16.msra.mxu2 %v1791_v14  ;;  %v2132_v14 = vld [vmem:[%s2726_s13 + $0x3f8] sm:$0xf0] }
  0x92   : > { %1310 = vmatpush.bf16.msra.mxu3 %v1855_v19  ;;  %v2071_v19 = vor.u32 %v2260_v8, %v2068_v9  ;;  %v2135_v23 = vor.u32 %v2276_v13, %v2132_v14  ;;  %v2234_v8 = vld [vmem:[%s2726_s13 + $0x2a4] sm:$0xf]  ;;  %v2103_v9 = vor.u32 %v2268_v0, %v2100_v1  ;;  %v2028_v13 = vld [vmem:[%s2726_s13 + $0x328] sm:$0xf0]  ;;  %v333_v0 = vld [vmem:[#allocation2 + $0x10] sm:$0xff] }
  0x93   : > { %1269 = vmatpush.bf16.msra.mxu0 %v1655_v25  ;;  %v2258_v25 = vld [vmem:[%s2726_s13 + $0x364] sm:$0xf] }
  0x94   : > { %1283 = vmatpush.bf16.msra.mxu1 %v1719_v26  ;;  %v2060_v26 = vld [vmem:[%s2726_s13 + $0x368] sm:$0xf0]  ;;  %v2266_v14 = vld [vmem:[%s2726_s13 + $0x3a4] sm:$0xf] }
  0x95   : > { %1297 = vmatpush.bf16.msra.mxu2 %v1783_v27  ;;  %v2274_v27 = vld [vmem:[%s2726_s13 + $0x3e4] sm:$0xf] }
  0x96   : > { %1311 = vmatpush.bf16.msra.mxu3 %v1847_v31  ;;  %v2063_v31 = vor.u32 %v2258_v25, %v2060_v26  ;;  %v2127_v35 = vor.u32 %v2274_v27, %v2124_v28  ;;  %v2248_v25 = vld [vmem:[%s2726_s13 + $0x314] sm:$0xf]  ;;  %v2020_v26 = vld [vmem:[%s2726_s13 + $0x318] sm:$0xf0] }
  0x97   : > { %1270 = vmatpush.bf16.msra.mxu0 %v1647_v37  ;;  %v2256_v37 = vld [vmem:[%s2726_s13 + $0x354] sm:$0xf]  ;;  %v2084_v28 = vld [vmem:[%s2726_s13 + $0x398] sm:$0xf0] }
  0x98   : > { %1284 = vmatpush.bf16.msra.mxu1 %v1711_v38  ;;  %v2052_v38 = vld [vmem:[%s2726_s13 + $0x358] sm:$0xf0]  ;;  %v2264_v27 = vld [vmem:[%s2726_s13 + $0x394] sm:$0xf] }
  0x99   : > { %1298 = vmatpush.bf16.msra.mxu2 %v1775_v39  ;;  %v2272_v39 = vld [vmem:[%s2726_s13 + $0x3d4] sm:$0xf]  ;;  %v2055_v43 = vor.u32 %v2256_v37, %v2052_v38  ;;  %v2246_v37 = vld [vmem:[%s2726_s13 + $0x304] sm:$0xf]  ;;  %v2012_v38 = vld [vmem:[%s2726_s13 + $0x308] sm:$0xf0] }
  0x9a   : > { %1312 = vmatpush.bf16.msra.mxu3 %v1839_v46  ;;  %v2222_v46 = vld [vmem:[%s2726_s13 + $0x244] sm:$0xf]  ;;  %v2119_v49 = vor.u32 %v2272_v39, %v2116_v41  ;;  %v2076_v41 = vld [vmem:[%s2726_s13 + $0x388] sm:$0xf0] }
  0x9b   : > { %1271 = vmatpush.bf16.msra.mxu0 %v1639_v53  ;;  %v2262_v39 = vld [vmem:[%s2726_s13 + $0x384] sm:$0xf] }
  0x9c   : > { %1285 = vmatpush.bf16.msra.mxu1 %v1703_v56  ;;  %v2220_v56 = vld [vmem:[%s2726_s13 + $0x234] sm:$0xf] }
  0x9d   : > { %1299 = vmatpush.bf16.msra.mxu2 %v1767_v57  ;;  %v1908_v57 = vld [vmem:[%s2726_s13 + $0x238] sm:$0xf0] }
  0x9e   : > { %1313 = vmatpush.bf16.msra.mxu3 %v1831_v62  ;;  %v2252_v62 = vld [vmem:[%s2726_s13 + $0x334] sm:$0xf]  ;;  %v1911_v3 = vor.u32 %v2220_v56, %v1908_v57 }
  0x9f   : > { %1272 = vmatpush.bf16.msra.mxu0 %v1631_v6  ;;  %v2039_v5 = vor.u32 %v2252_v62, %v2036_v63  ;;  %v2218_v6 = vld [vmem:[%s2726_s13 + $0x224] sm:$0xf] }
  0xa0   : > { %1286 = vmatpush.bf16.msra.mxu1 %v1695_v10  ;;  %v1964_v10 = vld [vmem:[%s2726_s13 + $0x2a8] sm:$0xf0] }
  0xa1   : > { %1300 = vmatpush.bf16.msra.mxu2 %v1759_v12  ;;  %v2250_v12 = vld [vmem:[%s2726_s13 + $0x324] sm:$0xf] }
  0xa2   : > { %1314 = vmatpush.bf16.msra.mxu3 %v1823_v15  ;;  %1273 = vmatmul.bf16.vlgmr.msra.gmra.mxu0 %v2821_v59  ;;  %v2254_v59 = vld [vmem:[%s2726_s13 + $0x344] sm:$0xf]  ;;  %v2092_v15 = vld [vmem:[%s2726_s13 + $0x3a8] sm:$0xf0] }
  0xa3   : > { %1321 = vmatpush.bf16.msrb.mxu0 %v1943_v16  ;;  %1287 = vmatmul.bf16.vlgmr.msra.gmra.mxu1 %v2833_v11  ;;  %v2108_v11 = vld [vmem:[%s2726_s13 + $0x3c8] sm:$0xf0]  ;;  %v2047_v55 = vor.u32 %v2254_v59, %v2044_v51  ;;  %v1903_v16 = vor.u32 %v2218_v6, %v1900_v7 }
  0xa4   : > { %1335 = vmatpush.bf16.msrb.mxu1 %v2007_v17  ;;  %1301 = vmatmul.bf16.vlgmr.msra.gmra.mxu2 %v2826_v2  ;;  %v1991_v2 = vor.u32 %v2240_v34, %v1988_v36  ;;  %v2111_v60 = vor.u32 %v2270_v52, %v2108_v11  ;;  %v1967_v17 = vor.u32 %v2234_v8, %v1964_v10  ;;  %v2230_v34 = vld [vmem:[%s2726_s13 + $0x284] sm:$0xf]  ;;  %v1948_v36 = vld [vmem:[%s2726_s13 + $0x288] sm:$0xf0]  ;;  %v335_v10 = vld [vmem:[#allocation2 + $0x18] sm:$0xff] }
  0xa5   : > { %1349 = vmatpush.bf16.msrb.mxu2 %v2071_v19  ;;  %1315 = vmatmul.bf16.vlgmr.msra.gmra.mxu3 %v2838_v18  ;;  %v1916_v18 = vld [vmem:[%s2726_s13 + $0x248] sm:$0xf0]  ;;  %v2031_v19 = vor.u32 %v2250_v12, %v2028_v13 }
  0xa6   : > { %1363 = vmatpush.bf16.msrb.mxu3 %v2135_v23  ;;  %v1919_v53 = vor.u32 %v2222_v46, %v1916_v18  ;;  %v2095_v23 = vor.u32 %v2266_v14, %v2092_v15  ;;  %v2079_v46 = vor.u32 %v2262_v39, %v2076_v41 }
  0xa7   : > { %1322 = vmatpush.bf16.msrb.mxu0 %v1935_v29  ;;  %v1895_v29 = vor.u32 %v2216_v20, %v1892_v21 }
  0xa8   : > { %1336 = vmatpush.bf16.msrb.mxu1 %v1999_v30  ;;  %v1959_v30 = vor.u32 %v2232_v22, %v1956_v24 }
  0xa9   : > { %1350 = vmatpush.bf16.msrb.mxu2 %v2063_v31  ;;  %v2023_v31 = vor.u32 %v2248_v25, %v2020_v26 }
  0xaa   : > { %1364 = vmatpush.bf16.msrb.mxu3 %v2127_v35  ;;  %v2087_v35 = vor.u32 %v2264_v27, %v2084_v28 }
  0xab   : > { %1323 = vmatpush.bf16.msrb.mxu0 %v1927_v42  ;;  %v1887_v42 = vor.u32 %v2214_v32, %v1884_v33 }
  0xac   : > { %1337 = vmatpush.bf16.msrb.mxu1 %v1991_v2  ;;  %v1951_v2 = vor.u32 %v2230_v34, %v1948_v36 }
  0xad   : > { %1351 = vmatpush.bf16.msrb.mxu2 %v2055_v43  ;;  %v2015_v43 = vor.u32 %v2246_v37, %v2012_v38  ;;  %v334_v37 = vld [vmem:[#allocation2] sm:$0xff] }
  0xae   : > { %1365 = vmatpush.bf16.msrb.mxu3 %v2119_v49 }
  0xaf   : > { %1324 = vmatpush.bf16.msrb.mxu0 %v1919_v53 }
  0xb0   : > { %1338 = vmatpush.bf16.msrb.mxu1 %v1983_v54 }
  0xb1   : > { %1352 = vmatpush.bf16.msrb.mxu2 %v2047_v55 }
  0xb2   : > { %1366 = vmatpush.bf16.msrb.mxu3 %v2111_v60 }
  0xb3   : > { %1325 = vmatpush.bf16.msrb.mxu0 %v1911_v3 }
  0xb4   : > { %1339 = vmatpush.bf16.msrb.mxu1 %v1975_v4 }
  0xb5   : > { %1353 = vmatpush.bf16.msrb.mxu2 %v2039_v5 }
  0xb6   : > { %1367 = vmatpush.bf16.msrb.mxu3 %v2103_v9 }
  0xb7   : > { %1326 = vmatpush.bf16.msrb.mxu0 %v1903_v16 }
  0xb8   : > { %1340 = vmatpush.bf16.msrb.mxu1 %v1967_v17 }
  0xb9   : > { %1354 = vmatpush.bf16.msrb.mxu2 %v2031_v19 }
  0xba   : > { %1368 = vmatpush.bf16.msrb.mxu3 %v2095_v23 }
  0xbb   : > { %1327 = vmatpush.bf16.msrb.mxu0 %v1895_v29 }
  0xbc   : > { %1341 = vmatpush.bf16.msrb.mxu1 %v1959_v30 }
  0xbd   : > { %1355 = vmatpush.bf16.msrb.mxu2 %v2023_v31 }
  0xbe   : > { %1369 = vmatpush.bf16.msrb.mxu3 %v2087_v35 }
  0xbf   : > { %1328 = vmatpush.bf16.msrb.mxu0 %v1887_v42 }
  0xc0   : > { %1342 = vmatpush.bf16.msrb.mxu1 %v1951_v2 }
  0xc1   : > { %1356 = vmatpush.bf16.msrb.mxu2 %v2015_v43 }
  0xc2   : > { %1370 = vmatpush.bf16.msrb.mxu3 %v2079_v46  ;;  %1329 = vmatmul.bf16.vlgmr.msrb.gmra.mxu0 %v2890_v40 }
  0xc3   : > { %1343 = vmatmul.bf16.vlgmr.msrb.gmra.mxu1 %v2897_v45 }
  0xc4   : > { %1357 = vmatmul.bf16.vlgmr.msrb.gmra.mxu2 %v2895_v44 }
  0xc5   : > { %1371 = vmatmul.bf16.vlgmr.msrb.gmra.mxu3 %v2901_v48 }
  0xdf   : > { %v1162_v18 = vpop.f32.mrf.mxu0 }
  0xe0   : > { %v1176_v47 = vpop.f32.mrf.mxu1 }
  0xe1   : > { %v1177_v59 = vadd.f32 %v1176_v47, %v1162_v18  ;;  %v336_v18 = vld [vmem:[#allocation2 + $0x8] sm:$0xff] }
  0xe7   : > { %v1190_v49 = vpop.f32.mrf.mxu2  ;;  %v1164_v51 = vpop.f32.mrf.mxu0 }
  0xe8   : > { %v1204_v50 = vpop.f32.mrf.mxu3  ;;  %v1178_v52 = vpop.f32.mrf.mxu1  ;;  %v1191_v11 = vadd.f32 %v1190_v49, %v1177_v59 }
  0xe9   : > { %v1179_v56 = vadd.f32 %v1178_v52, %v1164_v51 }
  0xea   : > { %v1205_v53 = vadd.f32 %v1204_v50, %v1191_v11 }
  0xef   : > { %v1192_v54 = vpop.f32.mrf.mxu2 }
  0xf0   : > { %v1206_v55 = vpop.f32.mrf.mxu3  ;;  %v1193_v45 = vadd.f32 %v1192_v54, %v1179_v56 }
  0xf2   : > { %v1207_v61 = vadd.f32 %v1206_v55, %v1193_v45 }
  0xff   : > { %v1218_v57 = vpop.f32.mrf.mxu0 }
 0x100   : > { %v1219_v40 = vadd.f32 %v1218_v57, %v1205_v53  ;;  %v1232_v58 = vpop.f32.mrf.mxu1 }
 0x102   : > { %v1233_v60 = vadd.f32 %v1232_v58, %v1219_v40 }
 0x107   : > { %v1246_v44 = vpop.f32.mrf.mxu2  ;;  %v1220_v62 = vpop.f32.mrf.mxu0 }
 0x108   : > { %v1247_v48 = vadd.f32 %v1246_v44, %v1233_v60  ;;  %v1260_v63 = vpop.f32.mrf.mxu3  ;;  %v1221_v1 = vadd.f32 %v1220_v62, %v1207_v61  ;;  %v1234_v4 = vpop.f32.mrf.mxu1 }
 0x10a   : > { %v1261_v3 = vadd.f32 %v1260_v63, %v1247_v48  ;;  %v1235_v6 = vadd.f32 %v1234_v4, %v1221_v1 }
 0x10c   : > { %v1377_v5 = vadd.f32 %v1261_v3, %v333_v0 }
 0x10e   : > { %1381 = vst [vmem:[#allocation2 + $0x10] sm:$0xff] %v1377_v5 }
 0x10f   : > { %v1248_v7 = vpop.f32.mrf.mxu2 }
 0x110   : > { %v1249_v8 = vadd.f32 %v1248_v7, %v1235_v6  ;;  %v1262_v9 = vpop.f32.mrf.mxu3 }
 0x112   : > { %v1263_v12 = vadd.f32 %v1262_v9, %v1249_v8 }
 0x114   : > { %v1379_v13 = vadd.f32 %v1263_v12, %v335_v10 }
 0x116   : > { %1383 = vst [vmem:[#allocation2 + $0x18] sm:$0xff] %v1379_v13 }
 0x11f   : > { %v1274_v14 = vpop.f32.mrf.mxu0 }
 0x120   : > { %v1288_v15 = vpop.f32.mrf.mxu1 }
 0x121   : > { %v1289_v19 = vadd.f32 %v1288_v15, %v1274_v14 }
 0x127   : > { %v1302_v16 = vpop.f32.mrf.mxu2  ;;  %v1276_v20 = vpop.f32.mrf.mxu0 }
 0x128   : > { %v1316_v17 = vpop.f32.mrf.mxu3  ;;  %v1290_v21 = vpop.f32.mrf.mxu1  ;;  %v1303_v22 = vadd.f32 %v1302_v16, %v1289_v19 }
 0x129   : > { %v1291_v25 = vadd.f32 %v1290_v21, %v1276_v20 }
 0x12a   : > { %v1317_v24 = vadd.f32 %v1316_v17, %v1303_v22 }
 0x12f   : > { %v1304_v23 = vpop.f32.mrf.mxu2 }
 0x130   : > { %v1318_v26 = vpop.f32.mrf.mxu3  ;;  %v1305_v30 = vadd.f32 %v1304_v23, %v1291_v25 }
 0x132   : > { %v1319_v33 = vadd.f32 %v1318_v26, %v1305_v30 }
 0x13f   : > { %v1330_v27 = vpop.f32.mrf.mxu0 }
 0x140   : > { %v1331_v28 = vadd.f32 %v1330_v27, %v1317_v24  ;;  %v1344_v29 = vpop.f32.mrf.mxu1 }
 0x142   : > { %v1345_v31 = vadd.f32 %v1344_v29, %v1331_v28 }
 0x147   : > { %v1358_v32 = vpop.f32.mrf.mxu2  ;;  %v1332_v36 = vpop.f32.mrf.mxu0 }
 0x148   : > { %v1359_v34 = vadd.f32 %v1358_v32, %v1345_v31  ;;  %v1372_v35 = vpop.f32.mrf.mxu3  ;;  %v1333_v39 = vadd.f32 %v1332_v36, %v1319_v33  ;;  %v1346_v42 = vpop.f32.mrf.mxu1 }
 0x14a   : > { %v1373_v38 = vadd.f32 %v1372_v35, %v1359_v34  ;;  %v1347_v2 = vadd.f32 %v1346_v42, %v1333_v39 }
 0x14c   : > { %v1378_v41 = vadd.f32 %v1373_v38, %v334_v37 }
 0x14e   : > { %1382 = vst [vmem:[#allocation2] sm:$0xff] %v1378_v41 }
 0x14f   : > { %v1360_v43 = vpop.f32.mrf.mxu2 }
 0x150   : > { %v1361_v46 = vadd.f32 %v1360_v43, %v1347_v2  ;;  %v1374_v47 = vpop.f32.mrf.mxu3 }
 0x152   : > { %v1375_v49 = vadd.f32 %v1374_v47, %v1361_v46 }
 0x154   : > { %v1380_v50 = vadd.f32 %v1375_v49, %v336_v18 }
 0x156   : > { %1384 = vst [vmem:[#allocation2 + $0x8] sm:$0xff] %v1380_v50 }
 0x157 PF: > { %v1388_v59 = vld [vmem:[#allocation2 + $0x10] sm:$0xff]  ;;  %v1396_v51 = vld [vmem:[%s2735_s17] sm:$0x3]  ;;  %s2278_s25 = sshll.u32 %s2548_s22, 4  ;;  %v1390_v56 = vld [vmem:[#allocation2 + $0x18] sm:$0xff]  ;;  %s1426_s15 = sshll.u32 %s2737_s9, 4  ;;  %s1427_s15 = int_to_ptr.vmem [resolvable:$true] %s1426_s15 }
 0x158   : > { %v1389_v52 = vld [vmem:[#allocation2] sm:$0xff]  ;;  %v1392_v11 = vmul.f32 2.0, %v1388_v59  ;;  %v1398_v53 = vperm.slane %v1396_v51, 0  ;;  %v1399_v55 = vperm.slane %v1396_v51, 1  ;;  %s1425_s12 = scalar_lea.hbm %s3075_s4, %s2278_s25  ;;  %v1394_v40 = vmul.f32 2.0, %v1390_v56  ;;  %s1411_s22 = scalar_lea.sflag [#allocation7], %s2723_s6 }
 0x159   : > { %v1393_v54 = vmul.f32 2.0, %v1389_v52  ;;  %s1428_s16 = sshll.u32 %s1425_s12, 4  ;;  %s2488_s1 = scalar_lea.hbm %s3075_s4, 64  ;;  %s1429_s16 = int_to_ptr.hbm [resolvable:$true] %s1428_s16 }
 0x15a   : > { %v1402_v45 = vadd.f32 %v1398_v53, %v1392_v11  ;;  %v1404_v44 = vadd.f32 %v1398_v53, %v1394_v40  ;;  %s2482_s18 = sshra.s32 %s1429_s16, 4  ;;  %s2483_s18 = int_to_ptr.hbm [resolvable:$true] %s2482_s18 }
 0x15b   : > { %v1403_v60 = vadd.f32 %v1399_v55, %v1393_v54  ;;  %s2484_s28 = scalar_lea.hbm %s2483_s18, 32  ;;  %p2489_p11 = scmp.lt.s32.totalorder %s2483_s18, %s3075_s4 }
 0x15c   : > { %1406 = vst [vmem:[%s2737_s9] sm:$0xff] %v1402_v45  ;;  %p2485_p8 = scmp.ne.s32.totalorder %s2483_s18, %s2484_s28  ;;  %p2490_p12 = scmp.lt.s32.totalorder %s2488_s1, %s2484_s28 }
 0x15d   : > { %v1391_v57 = vld [vmem:[#allocation2 + $0x8] sm:$0xff]  ;;  %1407 = vst [vmem:[%s2737_s9 + $0x8] sm:$0xff] %v1403_v60 }
 0x15e   : > { %v1395_v58 = vmul.f32 2.0, %v1391_v57  ;;  %1408 = vst [vmem:[%s2737_s9 + $0x10] sm:$0xff] %v1404_v44  ;;  %p2486_p9 = pnand %p2485_p8, %p2686_p0  ;;  %p2491_p13 = por %p2490_p12, %p2489_p11 }
 0x160   : > { %v1405_v61 = vadd.f32 %v1399_v55, %v1395_v58  ;;  %p2487_p10 = pneg %p2486_p9 }
 0x162   : > { %1409 = vst [vmem:[%s2737_s9 + $0x18] sm:$0xff] %v1405_v61  ;;  %p2492_p4 = pnand %p2491_p13, %p2487_p10 }
 0x164   : > { %2495 = shalt.err (!%p2492_p4)
}
 0x165   : > { %s2565_s6 = smov 256   ;;  %s2566_s2 = smov 512  }
 0x166   : > { %s2567_s14 = smov 16  }
 0x167   : > { %2287 = dma.vmem_to_hbm [thread:$0]  (%p2686_p0), %s1427_s15, 512, %s1429_s16, %s1411_s22, %s2565_s6, %s2566_s2, %s2567_s14  }
 0x168 PF: > { %s1443_s7 = sand.u32 1, %s2536_s19   ;;  %p2301_p5 = pnand %p1572_p3, %p2690_p2 }
 0x169   : > { %s1444_s17 = scalar_lea.sflag [#allocation7], %s1443_s7 }
 0x16a   : > { %p2302_p1 = pneg %p2301_p5 }
 0x16c   : > { %2531 = dma.done.wait (%p2302_p1), %s1444_s17, 512  }
 0x16d   : > { %2533 = vsyncadd (%p2302_p1), %s1444_s17, 4294966784  ;;  %s29_s23 = sadd.s32 1, %s2556_s23   ;;  %s3086_s19 = smov %s2540_s20 }
 0x16e   : > { %p26_p6 = scmp.ge.s32.totalorder %s29_s23, 4   ;;  %s3087_s20 = smov %s2544_s21 }
 0x16f   : > { %s3088_s21 = smov %s2648_s5  ;;  %s3089_s22 = smov %s2552_s0 }
 0x170   : > { %s3090_s0 = smov %s3092_s24  ;;  %28 = sbr.rel (!%p26_p6) target bundleno = 14 (0xe), region = 106 }
 0x175   :  { %1450 = vsyncpa [#allocation6], 1 }
 0x176   :  { %1452 = vsyncpa [#allocation6 + $0x1], 1 }
 0x177   :  { %1453 = vsyncpa [#allocation9], 1 }
 0x178   :  { %1455 = vsyncpa [#allocation9 + $0x1], 1 }
 0x179   :  { %1456 = vsyncpa [#allocation7], 1 }
 0x17a   :  { %1458 = vsyncpa [#allocation7 + $0x1], 1 }

</bundles_post_ra>
